<compile_context>
chip_gen: v7x
topology: tpu7x:2x2x1
jax: 0.10.0
libtpu: 0.0.40
codegen_flags: <defaults>
</compile_context>

<pallas_src>
import jax
import jax.numpy as jnp
from jax import lax
from jax.experimental import pallas as pl
from jax.experimental.pallas import tpu as pltpu

INF = 1e38  # the PyTorch code uses +1e38 as "infinity" and writes -INF


def self_attention_kernel(x_ref, w_in_ref, w_out_ref, o_ref):
    bt, n, d = x_ref.shape

    # ---- input projection on a flattened [Bt*N, D] slab: q = x @ W_in.T ----
    x2 = x_ref[...].reshape(bt * n, d)                         # bf16
    q2 = lax.dot_general(x2, w_in_ref[...], (((1,), (1,)), ((), ())),
                         preferred_element_type=jnp.float32)   # [Bt*N, D] f32
    q_bf = q2.astype(jnp.bfloat16)                             # [Bt*N, D]
    q3 = q_bf.reshape(bt, n, d)                                # [Bt, N, D]

    # ---- scores = q @ q^T per batch: bf16 operands, f32 accumulation ----
    scores = jnp.einsum('bnd,bmd->bnm', q3, q3,
                        preferred_element_type=jnp.float32)    # [Bt, N, N]

    # ---- mask upper triangle INCLUDING diagonal (matches the torch code) ----
    row = lax.broadcasted_iota(jnp.int32, (n, n), 0)
    col = lax.broadcasted_iota(jnp.int32, (n, n), 1)
    scores = jnp.where((col >= row)[None], -INF, scores)

    # ---- softmax statistics in f32; normalization deferred past the PV dot ----
    m = jnp.max(scores, axis=-1, keepdims=True)
    e = jnp.exp(scores - m)                                    # [Bt, N, N] f32
    s = jnp.sum(e, axis=-1, keepdims=True)                     # [Bt, N, 1]
    inv = pl.reciprocal(s, approx=True)                        # EUP slot
    # weights[:, 0, :] = 0 folded into the per-row scale
    row0 = (lax.broadcasted_iota(jnp.int32, (n, 1), 0) != 0).astype(jnp.float32)
    scale = inv * row0[None]                                   # [Bt, N, 1]

    # diag(scale) . (E . Q) == (diag(scale) . E) . Q  -> scale the [Bt,N,D]
    # result instead of the [Bt,N,N] probabilities.
    mix = jnp.einsum('bnm,bmd->bnd', e.astype(jnp.bfloat16), q3,
                     preferred_element_type=jnp.float32)       # [Bt, N, D]
    mix = mix * scale

    # ---- fused output projection: [mix | q] @ W_out.T in one 2D-deep dot ----
    comb = jnp.concatenate(
        [mix.astype(jnp.bfloat16).reshape(bt * n, d), q_bf], axis=-1)  # bf16
    out2 = lax.dot_general(comb, w_out_ref[...], (((1,), (1,)), ((), ())),
                           preferred_element_type=jnp.float32)  # [Bt*N, D]

    if len(o_ref.shape) == 2:
        # lane-dense (Bt, N*D) output slab -> unmasked full-width stores
        o_ref[...] = out2.reshape(bt, n * d).astype(o_ref.dtype)
    else:
        o_ref[...] = out2.reshape(bt, n, d).astype(o_ref.dtype)


def _vmem_budget_bytes():
    """~80% of the physical per-core VMEM (leave headroom for compiler scratch)."""
    try:
        cap = int(pltpu.get_tpu_info().vmem_capacity_bytes)
    except Exception:
        cap = 64 * 1024 * 1024  # conservative (v7x per-TensorCore)
    return max(32 * 1024 * 1024, int(cap * 0.8))


def _multi_tensorcore():
    """True on parts with >1 TensorCore per chip (megacore / v7x)."""
    try:
        kind = jax.devices()[0].device_kind.lower()
    except Exception:
        return False
    return any(tag in kind for tag in ("v7", "v5p", "v4"))


def _per_batch_block_bytes(N, D):
    # f32 N^2 temporaries (scores/exp + bf16 exp copy) + N*D temporaries
    # (q f32/bf16, mix f32/bf16, out f32, double-buffered bf16 in / f32 out
    # blocks, bf16 comb) — deliberately generous.
    return 12 * N * N + 40 * N * D


def _weight_bytes(D):
    return 2 * 2 * (D * D + 2 * D * D)   # bf16, double-buffered worst case


def _pick_batch_block(B, N, D, *, budget, rows_target=512, multi_tc=False):
    """Batch elements per grid step, bounded by the VMEM budget and by a
    rows-per-MXU-slab target; require bt | B."""
    per_b = _per_batch_block_bytes(N, D)
    bt_mem = max(1, (budget - _weight_bytes(D)) // per_b)
    bt = max(1, min(B, rows_target // max(N, 1), bt_mem))
    if multi_tc and B > 1:
        # keep >= 2 grid steps so both TensorCores get work
        bt = min(bt, (B + 1) // 2)
    while B % bt:
        bt -= 1
    return bt


def _build_call(out_dtype, B, N, D, bt, lane_dense, vmem_limit, single_buffer_weights):
    if lane_dense:
        out_shape = jax.ShapeDtypeStruct((B, N * D), out_dtype)
        out_spec = pl.BlockSpec((bt, N * D), lambda b: (b, 0))
    else:
        out_shape = jax.ShapeDtypeStruct((B, N, D), out_dtype)
        out_spec = pl.BlockSpec((bt, N, D), lambda b: (b, 0, 0))

    w_kwargs = {}
    if single_buffer_weights:
        # Constant block index across the grid: a second pipeline buffer is
        # pure VMEM waste, so request single buffering.
        w_kwargs = dict(pipeline_mode=pl.Buffered(1))

    in_specs = [
        pl.BlockSpec((bt, N, D), lambda b: (b, 0, 0)),
        pl.BlockSpec((D, D), lambda b: (0, 0), **w_kwargs),
        pl.BlockSpec((D, 2 * D), lambda b: (0, 0), **w_kwargs),
    ]

    return pl.pallas_call(
        self_attention_kernel,
        out_shape=out_shape,
        grid_spec=pltpu.PrefetchScalarGridSpec(
            num_scalar_prefetch=0,
            grid=(B // bt,),
            in_specs=in_specs,
            out_specs=out_spec,
        ),
        compiler_params=pltpu.CompilerParams(
            dimension_semantics=("parallel",),
            vmem_limit_bytes=vmem_limit,
        ),
    )


def self_attention(x, w_in, w_out, *, rows_target=512):
    """x: [B, N, D]; w_in: [D, D] (Linear(D, D).weight); w_out: [D, 2D] (Linear(2D, D).weight)."""
    B, N, D = x.shape
    assert w_in.shape == (D, D) and w_out.shape == (D, 2 * D)
    out_dtype = x.dtype

    budget = _vmem_budget_bytes()
    multi_tc = _multi_tensorcore()
    bt = _pick_batch_block(B, N, D, budget=budget,
                           rows_target=rows_target, multi_tc=multi_tc)

    # bf16 at the HBM boundary (inputs are only ever consumed as bf16 MXU
    # operands, so this is numerically identical and halves the DMA bytes).
    x_bf = x.astype(jnp.bfloat16)
    w_in_bf = w_in.astype(jnp.bfloat16)
    w_out_bf = w_out.astype(jnp.bfloat16)

    # Lane-dense output only when legal under the (8,128) block constraint.
    lane_dense = (D % 128 != 0) and ((bt % 8 == 0) or (bt == B))

    needed = _weight_bytes(D) + bt * _per_batch_block_bytes(N, D)
    vmem_limit = int(min(max(needed, 32 * 1024 * 1024), budget))

    args = (x_bf, w_in_bf, w_out_bf)

    # Try the preferred configuration first; fall back gracefully if this
    # jax/Mosaic version rejects single-buffered weights or the lane-dense
    # in-kernel reshape.  The final config is the known-good baseline layout.
    configs = []
    if lane_dense:
        configs += [(True, True), (False, True)]
    configs += [(True, False), (False, False)]

    out = None
    used_lane_dense = False
    last_err = None
    for single_buf, ld in configs:
        try:
            out = _build_call(out_dtype, B, N, D, bt, ld, vmem_limit, single_buf)(*args)
            used_lane_dense = ld
            break
        except Exception as err:  # unsupported pipeline_mode / reshape, etc.
            last_err = err
    if out is None:
        raise last_err

    if used_lane_dense:
        out = out.reshape(B, N, D)
    return out


def reference(x, w_in, w_out):
    """Pure-JAX replica of the PyTorch forward, mimicking the kernel's bf16
    matmul-operand / f32-accumulation precision so the comparison is tight."""
    B, N, D = x.shape
    q = jnp.einsum('bnd,kd->bnk', x.astype(jnp.bfloat16), w_in.astype(jnp.bfloat16),
                   preferred_element_type=jnp.float32)
    qb = q.astype(jnp.bfloat16)
    scores = jnp.einsum('bnd,bmd->bnm', qb, qb, preferred_element_type=jnp.float32)
    mask = jnp.triu(jnp.ones((N, N), dtype=bool))
    scores = jnp.where(mask[None], -INF, scores)
    w = jax.nn.softmax(scores, axis=-1)
    w = w.at[:, 0, :].set(0.0)
    mix = jnp.einsum('bnm,bmd->bnd', w.astype(jnp.bfloat16), qb,
                     preferred_element_type=jnp.float32)
    combined = jnp.concatenate([mix, q], axis=-1).astype(jnp.bfloat16)
    return jnp.einsum('bnk,dk->bnd', combined, w_out.astype(jnp.bfloat16),
                      preferred_element_type=jnp.float32)


if __name__ == "__main__":
    B, N, D = 2, 16, 32
    key = jax.random.PRNGKey(0)
    kx, kwin, kwout = jax.random.split(key, 3)

    x = jax.random.normal(kx, (B, N, D), dtype=jnp.float32)
    # Deterministic parameter init mimicking nn.Linear's uniform(-1/sqrt(fan_in), 1/sqrt(fan_in))
    w_in = jax.random.uniform(kwin, (D, D), dtype=jnp.float32,
                              minval=-1.0 / (D ** 0.5), maxval=1.0 / (D ** 0.5))
    w_out = jax.random.uniform(kwout, (D, 2 * D), dtype=jnp.float32,
                               minval=-1.0 / ((2 * D) ** 0.5), maxval=1.0 / ((2 * D) ** 0.5))

    out = jax.block_until_ready(self_attention(x, w_in, w_out))
    ref = reference(x, w_in, w_out)

    assert out.shape == (B, N, D)
    # Tolerance covers the approx-reciprocal softmax normalization, the
    # deferred-normalization rounding order, and bf16 operand rounding.
    assert jnp.allclose(out, ref, atol=2e-2, rtol=2e-2), "mismatch vs pure-JAX reference"

    print("KERNEL_OK")
</pallas_src>

<mosaic_0001>
module attributes {stable_mosaic.version = 11 : i64} {
  func.func @self_attention_kernel(%arg0: i32, %arg1: memref<2x16x32xbf16, #tpu.memory_space<vmem>>, %arg2: memref<32x32xbf16, #tpu.memory_space<vmem>>, %arg3: memref<32x64xbf16, #tpu.memory_space<vmem>>, %arg4: memref<2x512xf32, #tpu.memory_space<vmem>>) attributes {dimension_semantics = [#tpu.dimension_semantics<parallel>], iteration_bounds = array<i64: 1>, scalar_prefetch = 0 : i64, scratch_operands = 0 : i64, tpu.core_type = #tpu.core_type<tc>, window_params = [{transform_indices = @transform_0, window_bounds = array<i64: 2, 16, 32>}, {pipeline_mode = #tpu.pipeline_mode<synchronous>, transform_indices = @transform_1, window_bounds = array<i64: 32, 32>}, {pipeline_mode = #tpu.pipeline_mode<synchronous>, transform_indices = @transform_2, window_bounds = array<i64: 32, 64>}, {transform_indices = @transform_3, window_bounds = array<i64: 2, 512>}]} {
    %c0 = arith.constant 0 : index
    %c0_0 = arith.constant 0 : index
    %c0_1 = arith.constant 0 : index
    %0 = vector.load %arg1[%c0, %c0_0, %c0_1] : memref<2x16x32xbf16, #tpu.memory_space<vmem>>, vector<2x16x32xbf16>
    %1 = vector.shape_cast %0 : vector<2x16x32xbf16> to vector<32x32xbf16>
    %c0_2 = arith.constant 0 : index
    %c0_3 = arith.constant 0 : index
    %2 = vector.load %arg2[%c0_2, %c0_3] : memref<32x32xbf16, #tpu.memory_space<vmem>>, vector<32x32xbf16>
    %cst = arith.constant dense<0.000000e+00> : vector<32x32xf32>
    %3 = tpu.matmul %1, %2, %cst {dimension_numbers = #tpu.dot_dimension_numbers<[1], [1], [0], [0], [0, 0, 1, 0], [], []>} : vector<32x32xbf16>, vector<32x32xbf16>, vector<32x32xf32> -> vector<32x32xf32>
    %4 = arith.truncf %3 : vector<32x32xf32> to vector<32x32xbf16>
    %5 = vector.shape_cast %4 : vector<32x32xbf16> to vector<2x16x32xbf16>
    "tpu.trace_start"() <{level = 10 : i32, message = "bnd,bmd->bnm"}> : () -> ()
    %cst_4 = arith.constant dense<0.000000e+00> : vector<2x16x16xf32>
    %6 = tpu.matmul %5, %5, %cst_4 {dimension_numbers = #tpu.dot_dimension_numbers<[2], [2], [1], [1], [0, 0, 0, 1, 1, 1], [0], [0]>} : vector<2x16x32xbf16>, vector<2x16x32xbf16>, vector<2x16x16xf32> -> vector<2x16x16xf32>
    "tpu.trace_stop"() : () -> ()
    %7 = tpu.iota {dimensions = array<i32: 0>} : vector<16x16xi32>
    %8 = tpu.iota {dimensions = array<i32: 1>} : vector<16x16xi32>
    %9 = arith.cmpi sge, %8, %7 : vector<16x16xi32>
    %10 = vector.shape_cast %9 : vector<16x16xi1> to vector<1x16x16xi1>
    %cst_5 = arith.constant -9.99999968E+37 : f32
    %11 = vector.shape_cast %10 : vector<1x16x16xi1> to vector<1x16x16xi1>
    %12 = vector.broadcast %11 : vector<1x16x16xi1> to vector<2x16x16xi1>
    %13 = vector.broadcast %cst_5 : f32 to vector<2x16x16xf32>
    %14 = arith.select %12, %13, %6 : vector<2x16x16xi1>, vector<2x16x16xf32>
    %cst_6 = arith.constant dense<0xFF800000> : vector<2x16xf32>
    %15 = vector.multi_reduction <maximumf>, %14, %cst_6 [2] : vector<2x16x16xf32> to vector<2x16xf32>
    %16 = vector.shape_cast %15 : vector<2x16xf32> to vector<2x16x1xf32>
    %17 = vector.broadcast %16 : vector<2x16x1xf32> to vector<2x16x16xf32>
    %18 = arith.subf %14, %17 : vector<2x16x16xf32>
    %19 = math.exp %18 : vector<2x16x16xf32>
    %cst_7 = arith.constant dense<0.000000e+00> : vector<2x16xf32>
    %20 = vector.multi_reduction <add>, %19, %cst_7 [2] : vector<2x16x16xf32> to vector<2x16xf32>
    %21 = vector.shape_cast %20 : vector<2x16xf32> to vector<2x16x1xf32>
    %22 = tpu.reciprocal %21 {approx = true} : vector<2x16x1xf32> -> vector<2x16x1xf32>
    %23 = tpu.iota {dimensions = array<i32: 0>} : vector<16x1xi32>
    %c0_i32 = arith.constant 0 : i32
    %24 = vector.broadcast %c0_i32 : i32 to vector<16x1xi32>
    %25 = arith.cmpi ne, %23, %24 : vector<16x1xi32>
    %26 = arith.extui %25 : vector<16x1xi1> to vector<16x1xi32>
    %27 = arith.sitofp %26 : vector<16x1xi32> to vector<16x1xf32>
    %28 = vector.shape_cast %27 : vector<16x1xf32> to vector<1x16x1xf32>
    %29 = vector.broadcast %28 : vector<1x16x1xf32> to vector<2x16x1xf32>
    %30 = arith.mulf %22, %29 : vector<2x16x1xf32>
    %31 = arith.truncf %19 : vector<2x16x16xf32> to vector<2x16x16xbf16>
    "tpu.trace_start"() <{level = 10 : i32, message = "bnm,bmd->bnd"}> : () -> ()
    %cst_8 = arith.constant dense<0.000000e+00> : vector<2x16x32xf32>
    %32 = tpu.matmul %31, %5, %cst_8 {dimension_numbers = #tpu.dot_dimension_numbers<[2], [1], [1], [2], [0, 0, 0, 1, 1, 2], [0], [0]>} : vector<2x16x16xbf16>, vector<2x16x32xbf16>, vector<2x16x32xf32> -> vector<2x16x32xf32>
    "tpu.trace_stop"() : () -> ()
    %33 = vector.broadcast %30 : vector<2x16x1xf32> to vector<2x16x32xf32>
    %34 = arith.mulf %32, %33 : vector<2x16x32xf32>
    %35 = arith.truncf %34 : vector<2x16x32xf32> to vector<2x16x32xbf16>
    %36 = vector.shape_cast %35 : vector<2x16x32xbf16> to vector<32x32xbf16>
    %37 = tpu.concatenate %36, %4 in 1 : vector<32x32xbf16>, vector<32x32xbf16> -> vector<32x64xbf16>
    %c0_9 = arith.constant 0 : index
    %c0_10 = arith.constant 0 : index
    %38 = vector.load %arg3[%c0_9, %c0_10] : memref<32x64xbf16, #tpu.memory_space<vmem>>, vector<32x64xbf16>
    %cst_11 = arith.constant dense<0.000000e+00> : vector<32x32xf32>
    %39 = tpu.matmul %37, %38, %cst_11 {dimension_numbers = #tpu.dot_dimension_numbers<[1], [1], [0], [0], [0, 0, 1, 0], [], []>} : vector<32x64xbf16>, vector<32x64xbf16>, vector<32x32xf32> -> vector<32x32xf32>
    %40 = vector.shape_cast %39 : vector<32x32xf32> to vector<2x512xf32>
    %c0_12 = arith.constant 0 : index
    %c0_13 = arith.constant 0 : index
    %41 = vector.load %arg4[%c0_12, %c0_13] : memref<2x512xf32, #tpu.memory_space<vmem>>, vector<2x512xf32>
    tpu.vector_store %arg4[%c0_12, %c0_13], %40 {strides = array<i32>} : memref<2x512xf32, #tpu.memory_space<vmem>>, vector<2x512xf32>,
    return
  }
  func.func @transform_0(%arg0: i32) -> (i32, i32, i32) {
    %c0_i32 = arith.constant 0 : i32
    %c0_i32_0 = arith.constant 0 : i32
    %c0_i32_1 = arith.constant 0 : i32
    return %arg0, %c0_i32, %c0_i32_0 : i32, i32, i32
  }
  func.func @transform_1(%arg0: i32) -> (i32, i32) {
    %c0_i32 = arith.constant 0 : i32
    %c0_i32_0 = arith.constant 0 : i32
    %c0_i32_1 = arith.constant 0 : i32
    return %c0_i32, %c0_i32_0 : i32, i32
  }
  func.func @transform_2(%arg0: i32) -> (i32, i32) {
    %c0_i32 = arith.constant 0 : i32
    %c0_i32_0 = arith.constant 0 : i32
    %c0_i32_1 = arith.constant 0 : i32
    return %c0_i32, %c0_i32_0 : i32, i32
  }
  func.func @transform_3(%arg0: i32) -> (i32, i32) {
    %c0_i32 = arith.constant 0 : i32
    %c0_i32_0 = arith.constant 0 : i32
    return %arg0, %c0_i32 : i32, i32
  }
}

module attributes {stable_mosaic.version = 11 : i64} {
  func.func @self_attention_kernel(%arg0: i32, %arg1: memref<2x16x32xbf16, #tpu.memory_space<vmem>>, %arg2: memref<32x32xbf16, #tpu.memory_space<vmem>>, %arg3: memref<32x64xbf16, #tpu.memory_space<vmem>>, %arg4: memref<2x512xf32, #tpu.memory_space<vmem>>) attributes {dimension_semantics = [#tpu.dimension_semantics<parallel>], iteration_bounds = array<i64: 1>, scalar_prefetch = 0 : i64, scratch_operands = 0 : i64, tpu.core_type = #tpu.core_type<tc>, window_params = [{transform_indices = @transform_0, window_bounds = array<i64: 2, 16, 32>}, {pipeline_mode = #tpu.pipeline_mode<synchronous>, transform_indices = @transform_1, window_bounds = array<i64: 32, 32>}, {pipeline_mode = #tpu.pipeline_mode<synchronous>, transform_indices = @transform_2, window_bounds = array<i64: 32, 64>}, {transform_indices = @transform_3, window_bounds = array<i64: 2, 512>}]} {
    %c0 = arith.constant 0 : index
    %c0_0 = arith.constant 0 : index
    %c0_1 = arith.constant 0 : index
    %0 = vector.load %arg1[%c0, %c0_0, %c0_1] : memref<2x16x32xbf16, #tpu.memory_space<vmem>>, vector<2x16x32xbf16>
    %1 = vector.shape_cast %0 : vector<2x16x32xbf16> to vector<32x32xbf16>
    %c0_2 = arith.constant 0 : index
    %c0_3 = arith.constant 0 : index
    %2 = vector.load %arg2[%c0_2, %c0_3] : memref<32x32xbf16, #tpu.memory_space<vmem>>, vector<32x32xbf16>
    %cst = arith.constant dense<0.000000e+00> : vector<32x32xf32>
    %3 = tpu.matmul %1, %2, %cst {dimension_numbers = #tpu.dot_dimension_numbers<[1], [1], [0], [0], [0, 0, 1, 0], [], []>} : vector<32x32xbf16>, vector<32x32xbf16>, vector<32x32xf32> -> vector<32x32xf32>
    %4 = arith.truncf %3 : vector<32x32xf32> to vector<32x32xbf16>
    %5 = vector.shape_cast %4 : vector<32x32xbf16> to vector<2x16x32xbf16>
    "tpu.trace_start"() <{level = 10 : i32, message = "bnd,bmd->bnm"}> : () -> ()
    %cst_4 = arith.constant dense<0.000000e+00> : vector<2x16x16xf32>
    %6 = tpu.matmul %5, %5, %cst_4 {dimension_numbers = #tpu.dot_dimension_numbers<[2], [2], [1], [1], [0, 0, 0, 1, 1, 1], [0], [0]>} : vector<2x16x32xbf16>, vector<2x16x32xbf16>, vector<2x16x16xf32> -> vector<2x16x16xf32>
    "tpu.trace_stop"() : () -> ()
    %7 = tpu.iota {dimensions = array<i32: 0>} : vector<16x16xi32>
    %8 = tpu.iota {dimensions = array<i32: 1>} : vector<16x16xi32>
    %9 = arith.cmpi sge, %8, %7 : vector<16x16xi32>
    %10 = vector.shape_cast %9 : vector<16x16xi1> to vector<1x16x16xi1>
    %cst_5 = arith.constant -9.99999968E+37 : f32
    %11 = vector.shape_cast %10 : vector<1x16x16xi1> to vector<1x16x16xi1>
    %12 = vector.broadcast %11 : vector<1x16x16xi1> to vector<2x16x16xi1>
    %13 = vector.broadcast %cst_5 : f32 to vector<2x16x16xf32>
    %14 = arith.select %12, %13, %6 : vector<2x16x16xi1>, vector<2x16x16xf32>
    %cst_6 = arith.constant dense<0xFF800000> : vector<2x16xf32>
    %15 = vector.multi_reduction <maximumf>, %14, %cst_6 [2] : vector<2x16x16xf32> to vector<2x16xf32>
    %16 = vector.shape_cast %15 : vector<2x16xf32> to vector<2x16x1xf32>
    %17 = vector.broadcast %16 : vector<2x16x1xf32> to vector<2x16x16xf32>
    %18 = arith.subf %14, %17 : vector<2x16x16xf32>
    %19 = math.exp %18 : vector<2x16x16xf32>
    %cst_7 = arith.constant dense<0.000000e+00> : vector<2x16xf32>
    %20 = vector.multi_reduction <add>, %19, %cst_7 [2] : vector<2x16x16xf32> to vector<2x16xf32>
    %21 = vector.shape_cast %20 : vector<2x16xf32> to vector<2x16x1xf32>
    %22 = tpu.reciprocal %21 {approx = true} : vector<2x16x1xf32> -> vector<2x16x1xf32>
    %23 = tpu.iota {dimensions = array<i32: 0>} : vector<16x1xi32>
    %c0_i32 = arith.constant 0 : i32
    %24 = vector.broadcast %c0_i32 : i32 to vector<16x1xi32>
    %25 = arith.cmpi ne, %23, %24 : vector<16x1xi32>
    %26 = arith.extui %25 : vector<16x1xi1> to vector<16x1xi32>
    %27 = arith.sitofp %26 : vector<16x1xi32> to vector<16x1xf32>
    %28 = vector.shape_cast %27 : vector<16x1xf32> to vector<1x16x1xf32>
    %29 = vector.broadcast %28 : vector<1x16x1xf32> to vector<2x16x1xf32>
    %30 = arith.mulf %22, %29 : vector<2x16x1xf32>
    %31 = arith.truncf %19 : vector<2x16x16xf32> to vector<2x16x16xbf16>
    "tpu.trace_start"() <{level = 10 : i32, message = "bnm,bmd->bnd"}> : () -> ()
    %cst_8 = arith.constant dense<0.000000e+00> : vector<2x16x32xf32>
    %32 = tpu.matmul %31, %5, %cst_8 {dimension_numbers = #tpu.dot_dimension_numbers<[2], [1], [1], [2], [0, 0, 0, 1, 1, 2], [0], [0]>} : vector<2x16x16xbf16>, vector<2x16x32xbf16>, vector<2x16x32xf32> -> vector<2x16x32xf32>
    "tpu.trace_stop"() : () -> ()
    %33 = vector.broadcast %30 : vector<2x16x1xf32> to vector<2x16x32xf32>
    %34 = arith.mulf %32, %33 : vector<2x16x32xf32>
    %35 = arith.truncf %34 : vector<2x16x32xf32> to vector<2x16x32xbf16>
    %36 = vector.shape_cast %35 : vector<2x16x32xbf16> to vector<32x32xbf16>
    %37 = tpu.concatenate %36, %4 in 1 : vector<32x32xbf16>, vector<32x32xbf16> -> vector<32x64xbf16>
    %c0_9 = arith.constant 0 : index
    %c0_10 = arith.constant 0 : index
    %38 = vector.load %arg3[%c0_9, %c0_10] : memref<32x64xbf16, #tpu.memory_space<vmem>>, vector<32x64xbf16>
    %cst_11 = arith.constant dense<0.000000e+00> : vector<32x32xf32>
    %39 = tpu.matmul %37, %38, %cst_11 {dimension_numbers = #tpu.dot_dimension_numbers<[1], [1], [0], [0], [0, 0, 1, 0], [], []>} : vector<32x64xbf16>, vector<32x64xbf16>, vector<32x32xf32> -> vector<32x32xf32>
    %40 = vector.shape_cast %39 : vector<32x32xf32> to vector<2x512xf32>
    %c0_12 = arith.constant 0 : index
    %c0_13 = arith.constant 0 : index
    %41 = vector.load %arg4[%c0_12, %c0_13] : memref<2x512xf32, #tpu.memory_space<vmem>>, vector<2x512xf32>
    tpu.vector_store %arg4[%c0_12, %c0_13], %40 {strides = array<i32>} : memref<2x512xf32, #tpu.memory_space<vmem>>, vector<2x512xf32>,
    return
  }
  func.func @transform_0(%arg0: i32) -> (i32, i32, i32) {
    %c0_i32 = arith.constant 0 : i32
    %c0_i32_0 = arith.constant 0 : i32
    %c0_i32_1 = arith.constant 0 : i32
    return %arg0, %c0_i32, %c0_i32_0 : i32, i32, i32
  }
  func.func @transform_1(%arg0: i32) -> (i32, i32) {
    %c0_i32 = arith.constant 0 : i32
    %c0_i32_0 = arith.constant 0 : i32
    %c0_i32_1 = arith.constant 0 : i32
    return %c0_i32, %c0_i32_0 : i32, i32
  }
  func.func @transform_2(%arg0: i32) -> (i32, i32) {
    %c0_i32 = arith.constant 0 : i32
    %c0_i32_0 = arith.constant 0 : i32
    %c0_i32_1 = arith.constant 0 : i32
    return %c0_i32, %c0_i32_0 : i32, i32
  }
  func.func @transform_3(%arg0: i32) -> (i32, i32) {
    %c0_i32 = arith.constant 0 : i32
    %c0_i32_0 = arith.constant 0 : i32
    return %arg0, %c0_i32 : i32, i32
  }
}

module attributes {stable_mosaic.version = 11 : i64} {
  func.func @self_attention_kernel(%arg0: i32, %arg1: memref<2x16x32xbf16, #tpu.memory_space<vmem>>, %arg2: memref<32x32xbf16, #tpu.memory_space<vmem>>, %arg3: memref<32x64xbf16, #tpu.memory_space<vmem>>, %arg4: memref<2x16x32xf32, #tpu.memory_space<vmem>>) attributes {dimension_semantics = [#tpu.dimension_semantics<parallel>], iteration_bounds = array<i64: 1>, scalar_prefetch = 0 : i64, scratch_operands = 0 : i64, tpu.core_type = #tpu.core_type<tc>, window_params = [{transform_indices = @transform_0, window_bounds = array<i64: 2, 16, 32>}, {pipeline_mode = #tpu.pipeline_mode<synchronous>, transform_indices = @transform_1, window_bounds = array<i64: 32, 32>}, {pipeline_mode = #tpu.pipeline_mode<synchronous>, transform_indices = @transform_2, window_bounds = array<i64: 32, 64>}, {transform_indices = @transform_3, window_bounds = array<i64: 2, 16, 32>}]} {
    %c0 = arith.constant 0 : index
    %c0_0 = arith.constant 0 : index
    %c0_1 = arith.constant 0 : index
    %0 = vector.load %arg1[%c0, %c0_0, %c0_1] : memref<2x16x32xbf16, #tpu.memory_space<vmem>>, vector<2x16x32xbf16>
    %1 = vector.shape_cast %0 : vector<2x16x32xbf16> to vector<32x32xbf16>
    %c0_2 = arith.constant 0 : index
    %c0_3 = arith.constant 0 : index
    %2 = vector.load %arg2[%c0_2, %c0_3] : memref<32x32xbf16, #tpu.memory_space<vmem>>, vector<32x32xbf16>
    %cst = arith.constant dense<0.000000e+00> : vector<32x32xf32>
    %3 = tpu.matmul %1, %2, %cst {dimension_numbers = #tpu.dot_dimension_numbers<[1], [1], [0], [0], [0, 0, 1, 0], [], []>} : vector<32x32xbf16>, vector<32x32xbf16>, vector<32x32xf32> -> vector<32x32xf32>
    %4 = arith.truncf %3 : vector<32x32xf32> to vector<32x32xbf16>
    %5 = vector.shape_cast %4 : vector<32x32xbf16> to vector<2x16x32xbf16>
    "tpu.trace_start"() <{level = 10 : i32, message = "bnd,bmd->bnm"}> : () -> ()
    %cst_4 = arith.constant dense<0.000000e+00> : vector<2x16x16xf32>
    %6 = tpu.matmul %5, %5, %cst_4 {dimension_numbers = #tpu.dot_dimension_numbers<[2], [2], [1], [1], [0, 0, 0, 1, 1, 1], [0], [0]>} : vector<2x16x32xbf16>, vector<2x16x32xbf16>, vector<2x16x16xf32> -> vector<2x16x16xf32>
    "tpu.trace_stop"() : () -> ()
    %7 = tpu.iota {dimensions = array<i32: 0>} : vector<16x16xi32>
    %8 = tpu.iota {dimensions = array<i32: 1>} : vector<16x16xi32>
    %9 = arith.cmpi sge, %8, %7 : vector<16x16xi32>
    %10 = vector.shape_cast %9 : vector<16x16xi1> to vector<1x16x16xi1>
    %cst_5 = arith.constant -9.99999968E+37 : f32
    %11 = vector.shape_cast %10 : vector<1x16x16xi1> to vector<1x16x16xi1>
    %12 = vector.broadcast %11 : vector<1x16x16xi1> to vector<2x16x16xi1>
    %13 = vector.broadcast %cst_5 : f32 to vector<2x16x16xf32>
    %14 = arith.select %12, %13, %6 : vector<2x16x16xi1>, vector<2x16x16xf32>
    %cst_6 = arith.constant dense<0xFF800000> : vector<2x16xf32>
    %15 = vector.multi_reduction <maximumf>, %14, %cst_6 [2] : vector<2x16x16xf32> to vector<2x16xf32>
    %16 = vector.shape_cast %15 : vector<2x16xf32> to vector<2x16x1xf32>
    %17 = vector.broadcast %16 : vector<2x16x1xf32> to vector<2x16x16xf32>
    %18 = arith.subf %14, %17 : vector<2x16x16xf32>
    %19 = math.exp %18 : vector<2x16x16xf32>
    %cst_7 = arith.constant dense<0.000000e+00> : vector<2x16xf32>
    %20 = vector.multi_reduction <add>, %19, %cst_7 [2] : vector<2x16x16xf32> to vector<2x16xf32>
    %21 = vector.shape_cast %20 : vector<2x16xf32> to vector<2x16x1xf32>
    %22 = tpu.reciprocal %21 {approx = true} : vector<2x16x1xf32> -> vector<2x16x1xf32>
    %23 = tpu.iota {dimensions = array<i32: 0>} : vector<16x1xi32>
    %c0_i32 = arith.constant 0 : i32
    %24 = vector.broadcast %c0_i32 : i32 to vector<16x1xi32>
    %25 = arith.cmpi ne, %23, %24 : vector<16x1xi32>
    %26 = arith.extui %25 : vector<16x1xi1> to vector<16x1xi32>
    %27 = arith.sitofp %26 : vector<16x1xi32> to vector<16x1xf32>
    %28 = vector.shape_cast %27 : vector<16x1xf32> to vector<1x16x1xf32>
    %29 = vector.broadcast %28 : vector<1x16x1xf32> to vector<2x16x1xf32>
    %30 = arith.mulf %22, %29 : vector<2x16x1xf32>
    %31 = arith.truncf %19 : vector<2x16x16xf32> to vector<2x16x16xbf16>
    "tpu.trace_start"() <{level = 10 : i32, message = "bnm,bmd->bnd"}> : () -> ()
    %cst_8 = arith.constant dense<0.000000e+00> : vector<2x16x32xf32>
    %32 = tpu.matmul %31, %5, %cst_8 {dimension_numbers = #tpu.dot_dimension_numbers<[2], [1], [1], [2], [0, 0, 0, 1, 1, 2], [0], [0]>} : vector<2x16x16xbf16>, vector<2x16x32xbf16>, vector<2x16x32xf32> -> vector<2x16x32xf32>
    "tpu.trace_stop"() : () -> ()
    %33 = vector.broadcast %30 : vector<2x16x1xf32> to vector<2x16x32xf32>
    %34 = arith.mulf %32, %33 : vector<2x16x32xf32>
    %35 = arith.truncf %34 : vector<2x16x32xf32> to vector<2x16x32xbf16>
    %36 = vector.shape_cast %35 : vector<2x16x32xbf16> to vector<32x32xbf16>
    %37 = tpu.concatenate %36, %4 in 1 : vector<32x32xbf16>, vector<32x32xbf16> -> vector<32x64xbf16>
    %c0_9 = arith.constant 0 : index
    %c0_10 = arith.constant 0 : index
    %38 = vector.load %arg3[%c0_9, %c0_10] : memref<32x64xbf16, #tpu.memory_space<vmem>>, vector<32x64xbf16>
    %cst_11 = arith.constant dense<0.000000e+00> : vector<32x32xf32>
    %39 = tpu.matmul %37, %38, %cst_11 {dimension_numbers = #tpu.dot_dimension_numbers<[1], [1], [0], [0], [0, 0, 1, 0], [], []>} : vector<32x64xbf16>, vector<32x64xbf16>, vector<32x32xf32> -> vector<32x32xf32>
    %40 = vector.shape_cast %39 : vector<32x32xf32> to vector<2x16x32xf32>
    %c0_12 = arith.constant 0 : index
    %c0_13 = arith.constant 0 : index
    %c0_14 = arith.constant 0 : index
    %41 = vector.load %arg4[%c0_12, %c0_13, %c0_14] : memref<2x16x32xf32, #tpu.memory_space<vmem>>, vector<2x16x32xf32>
    tpu.vector_store %arg4[%c0_12, %c0_13, %c0_14], %40 {strides = array<i32>} : memref<2x16x32xf32, #tpu.memory_space<vmem>>, vector<2x16x32xf32>,
    return
  }
  func.func @transform_0(%arg0: i32) -> (i32, i32, i32) {
    %c0_i32 = arith.constant 0 : i32
    %c0_i32_0 = arith.constant 0 : i32
    %c0_i32_1 = arith.constant 0 : i32
    return %arg0, %c0_i32, %c0_i32_0 : i32, i32, i32
  }
  func.func @transform_1(%arg0: i32) -> (i32, i32) {
    %c0_i32 = arith.constant 0 : i32
    %c0_i32_0 = arith.constant 0 : i32
    %c0_i32_1 = arith.constant 0 : i32
    return %c0_i32, %c0_i32_0 : i32, i32
  }
  func.func @transform_2(%arg0: i32) -> (i32, i32) {
    %c0_i32 = arith.constant 0 : i32
    %c0_i32_0 = arith.constant 0 : i32
    %c0_i32_1 = arith.constant 0 : i32
    return %c0_i32, %c0_i32_0 : i32, i32
  }
  func.func @transform_3(%arg0: i32) -> (i32, i32, i32) {
    %c0_i32 = arith.constant 0 : i32
    %c0_i32_0 = arith.constant 0 : i32
    %c0_i32_1 = arith.constant 0 : i32
    return %arg0, %c0_i32, %c0_i32_0 : i32, i32, i32
  }
}

module attributes {stable_mosaic.version = 11 : i64} {
  func.func @self_attention_kernel(%arg0: i32, %arg1: memref<2x16x32xbf16, #tpu.memory_space<vmem>>, %arg2: memref<32x32xbf16, #tpu.memory_space<vmem>>, %arg3: memref<32x64xbf16, #tpu.memory_space<vmem>>, %arg4: memref<2x16x32xf32, #tpu.memory_space<vmem>>) attributes {dimension_semantics = [#tpu.dimension_semantics<parallel>], iteration_bounds = array<i64: 1>, scalar_prefetch = 0 : i64, scratch_operands = 0 : i64, tpu.core_type = #tpu.core_type<tc>, window_params = [{transform_indices = @transform_0, window_bounds = array<i64: 2, 16, 32>}, {pipeline_mode = #tpu.pipeline_mode<synchronous>, transform_indices = @transform_1, window_bounds = array<i64: 32, 32>}, {pipeline_mode = #tpu.pipeline_mode<synchronous>, transform_indices = @transform_2, window_bounds = array<i64: 32, 64>}, {transform_indices = @transform_3, window_bounds = array<i64: 2, 16, 32>}]} {
    %c0 = arith.constant 0 : index
    %c0_0 = arith.constant 0 : index
    %c0_1 = arith.constant 0 : index
    %0 = vector.load %arg1[%c0, %c0_0, %c0_1] : memref<2x16x32xbf16, #tpu.memory_space<vmem>>, vector<2x16x32xbf16>
    %1 = vector.shape_cast %0 : vector<2x16x32xbf16> to vector<32x32xbf16>
    %c0_2 = arith.constant 0 : index
    %c0_3 = arith.constant 0 : index
    %2 = vector.load %arg2[%c0_2, %c0_3] : memref<32x32xbf16, #tpu.memory_space<vmem>>, vector<32x32xbf16>
    %cst = arith.constant dense<0.000000e+00> : vector<32x32xf32>
    %3 = tpu.matmul %1, %2, %cst {dimension_numbers = #tpu.dot_dimension_numbers<[1], [1], [0], [0], [0, 0, 1, 0], [], []>} : vector<32x32xbf16>, vector<32x32xbf16>, vector<32x32xf32> -> vector<32x32xf32>
    %4 = arith.truncf %3 : vector<32x32xf32> to vector<32x32xbf16>
    %5 = vector.shape_cast %4 : vector<32x32xbf16> to vector<2x16x32xbf16>
    "tpu.trace_start"() <{level = 10 : i32, message = "bnd,bmd->bnm"}> : () -> ()
    %cst_4 = arith.constant dense<0.000000e+00> : vector<2x16x16xf32>
    %6 = tpu.matmul %5, %5, %cst_4 {dimension_numbers = #tpu.dot_dimension_numbers<[2], [2], [1], [1], [0, 0, 0, 1, 1, 1], [0], [0]>} : vector<2x16x32xbf16>, vector<2x16x32xbf16>, vector<2x16x16xf32> -> vector<2x16x16xf32>
    "tpu.trace_stop"() : () -> ()
    %7 = tpu.iota {dimensions = array<i32: 0>} : vector<16x16xi32>
    %8 = tpu.iota {dimensions = array<i32: 1>} : vector<16x16xi32>
    %9 = arith.cmpi sge, %8, %7 : vector<16x16xi32>
    %10 = vector.shape_cast %9 : vector<16x16xi1> to vector<1x16x16xi1>
    %cst_5 = arith.constant -9.99999968E+37 : f32
    %11 = vector.shape_cast %10 : vector<1x16x16xi1> to vector<1x16x16xi1>
    %12 = vector.broadcast %11 : vector<1x16x16xi1> to vector<2x16x16xi1>
    %13 = vector.broadcast %cst_5 : f32 to vector<2x16x16xf32>
    %14 = arith.select %12, %13, %6 : vector<2x16x16xi1>, vector<2x16x16xf32>
    %cst_6 = arith.constant dense<0xFF800000> : vector<2x16xf32>
    %15 = vector.multi_reduction <maximumf>, %14, %cst_6 [2] : vector<2x16x16xf32> to vector<2x16xf32>
    %16 = vector.shape_cast %15 : vector<2x16xf32> to vector<2x16x1xf32>
    %17 = vector.broadcast %16 : vector<2x16x1xf32> to vector<2x16x16xf32>
    %18 = arith.subf %14, %17 : vector<2x16x16xf32>
    %19 = math.exp %18 : vector<2x16x16xf32>
    %cst_7 = arith.constant dense<0.000000e+00> : vector<2x16xf32>
    %20 = vector.multi_reduction <add>, %19, %cst_7 [2] : vector<2x16x16xf32> to vector<2x16xf32>
    %21 = vector.shape_cast %20 : vector<2x16xf32> to vector<2x16x1xf32>
    %22 = tpu.reciprocal %21 {approx = true} : vector<2x16x1xf32> -> vector<2x16x1xf32>
    %23 = tpu.iota {dimensions = array<i32: 0>} : vector<16x1xi32>
    %c0_i32 = arith.constant 0 : i32
    %24 = vector.broadcast %c0_i32 : i32 to vector<16x1xi32>
    %25 = arith.cmpi ne, %23, %24 : vector<16x1xi32>
    %26 = arith.extui %25 : vector<16x1xi1> to vector<16x1xi32>
    %27 = arith.sitofp %26 : vector<16x1xi32> to vector<16x1xf32>
    %28 = vector.shape_cast %27 : vector<16x1xf32> to vector<1x16x1xf32>
    %29 = vector.broadcast %28 : vector<1x16x1xf32> to vector<2x16x1xf32>
    %30 = arith.mulf %22, %29 : vector<2x16x1xf32>
    %31 = arith.truncf %19 : vector<2x16x16xf32> to vector<2x16x16xbf16>
    "tpu.trace_start"() <{level = 10 : i32, message = "bnm,bmd->bnd"}> : () -> ()
    %cst_8 = arith.constant dense<0.000000e+00> : vector<2x16x32xf32>
    %32 = tpu.matmul %31, %5, %cst_8 {dimension_numbers = #tpu.dot_dimension_numbers<[2], [1], [1], [2], [0, 0, 0, 1, 1, 2], [0], [0]>} : vector<2x16x16xbf16>, vector<2x16x32xbf16>, vector<2x16x32xf32> -> vector<2x16x32xf32>
    "tpu.trace_stop"() : () -> ()
    %33 = vector.broadcast %30 : vector<2x16x1xf32> to vector<2x16x32xf32>
    %34 = arith.mulf %32, %33 : vector<2x16x32xf32>
    %35 = arith.truncf %34 : vector<2x16x32xf32> to vector<2x16x32xbf16>
    %36 = vector.shape_cast %35 : vector<2x16x32xbf16> to vector<32x32xbf16>
    %37 = tpu.concatenate %36, %4 in 1 : vector<32x32xbf16>, vector<32x32xbf16> -> vector<32x64xbf16>
    %c0_9 = arith.constant 0 : index
    %c0_10 = arith.constant 0 : index
    %38 = vector.load %arg3[%c0_9, %c0_10] : memref<32x64xbf16, #tpu.memory_space<vmem>>, vector<32x64xbf16>
    %cst_11 = arith.constant dense<0.000000e+00> : vector<32x32xf32>
    %39 = tpu.matmul %37, %38, %cst_11 {dimension_numbers = #tpu.dot_dimension_numbers<[1], [1], [0], [0], [0, 0, 1, 0], [], []>} : vector<32x64xbf16>, vector<32x64xbf16>, vector<32x32xf32> -> vector<32x32xf32>
    %40 = vector.shape_cast %39 : vector<32x32xf32> to vector<2x16x32xf32>
    %c0_12 = arith.constant 0 : index
    %c0_13 = arith.constant 0 : index
    %c0_14 = arith.constant 0 : index
    %41 = vector.load %arg4[%c0_12, %c0_13, %c0_14] : memref<2x16x32xf32, #tpu.memory_space<vmem>>, vector<2x16x32xf32>
    tpu.vector_store %arg4[%c0_12, %c0_13, %c0_14], %40 {strides = array<i32>} : memref<2x16x32xf32, #tpu.memory_space<vmem>>, vector<2x16x32xf32>,
    return
  }
  func.func @transform_0(%arg0: i32) -> (i32, i32, i32) {
    %c0_i32 = arith.constant 0 : i32
    %c0_i32_0 = arith.constant 0 : i32
    %c0_i32_1 = arith.constant 0 : i32
    return %arg0, %c0_i32, %c0_i32_0 : i32, i32, i32
  }
  func.func @transform_1(%arg0: i32) -> (i32, i32) {
    %c0_i32 = arith.constant 0 : i32
    %c0_i32_0 = arith.constant 0 : i32
    %c0_i32_1 = arith.constant 0 : i32
    return %c0_i32, %c0_i32_0 : i32, i32
  }
  func.func @transform_2(%arg0: i32) -> (i32, i32) {
    %c0_i32 = arith.constant 0 : i32
    %c0_i32_0 = arith.constant 0 : i32
    %c0_i32_1 = arith.constant 0 : i32
    return %c0_i32, %c0_i32_0 : i32, i32
  }
  func.func @transform_3(%arg0: i32) -> (i32, i32, i32) {
    %c0_i32 = arith.constant 0 : i32
    %c0_i32_0 = arith.constant 0 : i32
    %c0_i32_1 = arith.constant 0 : i32
    return %arg0, %c0_i32, %c0_i32_0 : i32, i32, i32
  }
}

</mosaic_0001>

<bundles_post_ra>
// kernel: tpu_custom_call.1
= control target key start
LH: loop header
LB: loop body
LE: loop exit
PB: predicated region body
PF: predicated region fallthrough
CT: control target
= control target key end

     0   :  { %8 = vsyncpa [#allocation3], 0  ;;  %s866_s0 = inlined_call_operand.hbm [shape: bf16[2,16,32], index: 0, kind: input, shape index: {}]   ;;  %s867_s1 = inlined_call_operand.hbm [shape: bf16[32,32], index: 1, kind: input, shape index: {}]   ;;  %s868_s2 = inlined_call_operand.hbm [shape: bf16[32,64], index: 2, kind: input, shape index: {}]   ;;  %s869_s3 = inlined_call_operand.hbm [shape: f32[2,16,32], index: 3, kind: output, shape index: {}]  }
   0x1   :  { %9 = vsyncpa [#allocation6], 0 }
   0x2   :  { %10 = vsyncpa [#allocation4], 0  ;;  %s709_s12 = smov [#allocation5]   ;;  %s710_s14 = smov [#allocation2]  }
   0x3   :  { %s28_s13 = sshll.u32 %s709_s12, 4  ;;  %s16_s15 = sshll.u32 %s710_s14, 4  ;;  %s29_s13 = int_to_ptr.vmem [resolvable:$true] %s28_s13  ;;  %s740_s15 = int_to_ptr.vmem [resolvable:$true] %s16_s15 }
   0x4   :  { %s615_s18 = scalar_lea.hbm %s867_s1, 256 }
   0x5   :  { %p616_p0 = scmp.ne.s32.totalorder %s867_s1, %s615_s18  ;;  %p619_p1 = scmp.lt.u32.totalorder %s615_s18, %s867_s1 }
   0x7   :  { %p621_p2 = pnand %p619_p1, %p616_p0 }
   0x9   :  { %624 = shalt.err (!%p621_p2)
}
   0xa   :  { %s625_s23 = scalar_lea.vmem %s29_s13, 256  ;;  %p630_p4 = scmp.lt.s32.totalorder %s29_s13, %s29_s13 }
   0xb   :  { %p626_p3 = scmp.ne.s32.totalorder %s29_s13, %s625_s23  ;;  %p631_p5 = scmp.lt.s32.totalorder %s625_s23, %s625_s23 }
   0xd   :  { %p632_p6 = por %p631_p5, %p630_p4 }
   0xf   :  { %p633_p7 = pnand %p632_p6, %p626_p3 }
  0x11   :  { %636 = shalt.err (!%p633_p7)
}
  0x12   :  { %s711_s24 = smov 64   ;;  %s712_s25 = smov 4  }
  0x13   :  { %34 = dma.hbm_to_vmem [thread:$0]  %s867_s1, 256, %s29_s13, [#allocation6], %s711_s24, %s711_s24, %s712_s25  }
  0x14   :  { %s637_s30 = scalar_lea.hbm %s866_s0, 256 }
  0x15   :  { %p638_p8 = scmp.ne.s32.totalorder %s866_s0, %s637_s30  ;;  %p641_p9 = scmp.lt.u32.totalorder %s637_s30, %s866_s0 }
  0x17   :  { %p643_p10 = pnand %p641_p9, %p638_p8 }
  0x19   :  { %646 = shalt.err (!%p643_p10)
}
  0x1a   :  { %s647_s8 = scalar_lea.vmem %s740_s15, 256  ;;  %p652_p12 = scmp.lt.s32.totalorder %s740_s15, %s740_s15 }
  0x1b   :  { %p648_p11 = scmp.ne.s32.totalorder %s740_s15, %s647_s8  ;;  %p653_p13 = scmp.lt.s32.totalorder %s647_s8, %s647_s8 }
  0x1d   :  { %p654_p0 = por %p653_p13, %p652_p12 }
  0x1f   :  { %p655_p1 = pnand %p654_p0, %p648_p11 }
  0x21   :  { %658 = shalt.err (!%p655_p1)
}
  0x22   :  { %22 = dma.hbm_to_vmem [thread:$0]  %s866_s0, 256, %s740_s15, [#allocation3], %s711_s24, %s711_s24, %s712_s25  }
  0x23   :  { %s713_s10 = smov [#allocation7]   ;;  %s659_s14 = scalar_lea.hbm %s868_s2, 256 }
  0x24   :  { %s40_s11 = sshll.u32 %s713_s10, 4  ;;  %p660_p2 = scmp.ne.s32.totalorder %s868_s2, %s659_s14  ;;  %s41_s11 = int_to_ptr.vmem [resolvable:$true] %s40_s11 }
  0x25   :  { %p663_p3 = scmp.lt.u32.totalorder %s659_s14, %s868_s2 }
  0x27   :  { %p665_p4 = pnand %p663_p3, %p660_p2 }
  0x29   :  { %668 = shalt.err (!%p665_p4)
}
  0x2a   :  { %s669_s20 = scalar_lea.vmem %s41_s11, 256  ;;  %p674_p6 = scmp.lt.s32.totalorder %s41_s11, %s41_s11 }
  0x2b   :  { %p670_p5 = scmp.ne.s32.totalorder %s41_s11, %s669_s20  ;;  %p675_p7 = scmp.lt.s32.totalorder %s669_s20, %s669_s20 }
  0x2d   :  { %p676_p8 = por %p675_p7, %p674_p6 }
  0x2f   :  { %p677_p9 = pnand %p676_p8, %p670_p5 }
  0x31   :  { %680 = shalt.err (!%p677_p9)
}
  0x32   :  { %46 = dma.hbm_to_vmem [thread:$0]  %s868_s2, 256, %s41_s11, [#allocation6], %s711_s24, %s711_s24, %s712_s25  }
  0x33   :  { %703 = dma.done.wait [#allocation3], 256  }
  0x34   :  { %704 = vsyncadd [#allocation3], 4294967040 }
  0x35   :  { %705 = dma.done.wait [#allocation6], 512  }
  0x36   :  { %706 = vsyncadd [#allocation6], 4294966784  ;;  %vm85_vm0 = vcmask 261120   ;;  %v593_v0 = vld [vmem:[#allocation5] sm:$0xff]   ;;  %v594_v1 = vld [vmem:[#allocation5 + $0x8] sm:$0xff]   ;;  %v714_v6 = vmov 0.0   ;;  %v237_v15 = vlaneseq }
  0x37   :  { %578 = vmatprep.subr.msk.bf16.mxu0 %vm85_vm0, %v593_v0  ;;  %v93_v2 = vsel %vm85_vm0, %v593_v0, 0  ;;  %v595_v3 = vld [vmem:[#allocation2] sm:$0xff]   ;;  %v96_v4 = vsel %vm85_vm0, %v594_v1, 0  ;;  %v596_v5 = vld [vmem:[#allocation2 + $0x8] sm:$0xff]   ;;  %546 = vmatprep.subr.bf16.mxu1 %v714_v6  ;;  %vm715_vm1 = vmmov 0   ;;  %vm252_vm3 = vcmask 130048  }
  0x38   :  { %539 = vmatpush3.bf16.xpose.msra.mxu0 %v93_v2  ;;  %542 = vmatprep.mubr.msk.bf16.mxu0 %vm85_vm0, %v595_v3  ;;  %v821_v16 = vshrl.u32 %v237_v15, 7  ;;  %v241_v17 = vand.u32 127, %v237_v15  ;;  %s716_s2 = smov 32   ;;  %v597_v57 = vld [vmem:[#allocation7] sm:$0xff]   ;;  %vm425_vm5 = vcmask 523264   ;;  %v598_v59 = vld [vmem:[#allocation7 + $0x8] sm:$0xff]  }
  0x39   :  { %579 = vmatprep.subr.msk.bf16.mxu0 %vm85_vm0, %v594_v1  ;;  %548 = vmatprep.mubr.msk.bf16.mxu1 %vm715_vm1, %v714_v6  ;;  %v431_v58 = vsel %vm425_vm5, %v597_v57, 0  ;;  %v434_v60 = vsel %vm425_vm5, %v598_v59, 0  ;;  %s717_s21 = smov [#allocation8]  }
  0x3a   :  { %v239_v18 = vadd.s32 8, %v821_v16  ;;  %vm242_vm2 = vcmp.ge.s32.totalorder %v241_v17, %v821_v16  ;;  %vm293_vm6 = vcmp.ne.s32.totalorder %v821_v16, 0  ;;  %s494_s22 = sshll.u32 %s717_s21, 4  ;;  %s495_s22 = int_to_ptr.vmem [resolvable:$true] %s494_s22 }
  0x3b   :  { %v515_v2 = vsel %vm293_vm6, 1.0, %v714_v6  ;;  %s681_s23 = scalar_lea.vmem %s495_s22, 512  ;;  %p686_p11 = scmp.lt.s32.totalorder %s495_s22, %s495_s22 }
  0x3c   :  { %vm243_vm4 = vcmp.ge.s32.totalorder %v241_v17, %v239_v18  ;;  %p682_p10 = scmp.ne.s32.totalorder %s495_s22, %s681_s23  ;;  %p687_p12 = scmp.lt.s32.totalorder %s681_s23, %s681_s23 }
  0x3e   :  { %p688_p13 = por %p687_p12, %p686_p11 }
  0x40   :  { %541 = vmatpush3.bf16.xpose.msra.mxu0 %v96_v4  ;;  %p689_p0 = pnand %p688_p13, %p682_p10 }
  0x41   :  { %580 = vmatprep.subr.msk.bf16.mxu0 %vm425_vm5, %v597_v57 }
  0x47   :  { %543 = vmatmul.mubr.msk.bf16.vlgmr.msra.gmra.mrb[0].mxu0 %vm85_vm0, %v596_v5 }
  0x48   :  { %571 = vmatpush3.bf16.xpose.msra.mxu0 %v431_v58 }
  0x49   :  { %581 = vmatprep.subr.msk.bf16.mxu0 %vm425_vm5, %v598_v59 }
  0x50   :  { %573 = vmatpush3.bf16.xpose.msra.mxu0 %v434_v60 }
 0x11a   :  { %v544_v7 = vpop.f32.mrb[0].mxu0 }
 0x11b   :  { %v132_v8 = vpop.f32.mrb[1].mxu0 }
 0x11c   :  { %v545_v9 = vpop.f32.mrb[2].mxu0 }
 0x11d   :  { %v801_v10 = vpack.c.bf16 %v545_v9, %v544_v7  ;;  %v135_v11 = vpop.f32.mrb[3].mxu0 }
 0x11e   :  { %v803_v12 = vpack.c.bf16 %v135_v11, %v132_v8 }
 0x11f   :  { %v194_v14 = vsel %vm85_vm0, %v801_v10, 0 }
 0x120   :  { %v150_v13 = vsel %vm85_vm0, %v803_v12, 0 }
 0x121   :  { %547 = vmatpush3.bf16.xpose.msra.mxu1 %v150_v13 }
 0x122   :  { %552 = vmatprep.subr.bf16.mxu1 %v714_v6 }
 0x128   :  { %549 = vmatmul.mubr.msk.bf16.vlgmr.msra.gmra.mrb[0].mxu1 %vm85_vm0, %v803_v12 }
 0x129   :  { %553 = vmatpush3.bf16.xpose.msra.mxu1 %v194_v14  ;;  %554 = vmatprep.mubr.msk.bf16.mxu1 %vm715_vm1, %v714_v6 }
 0x12a   :  { %558 = vmatprep.subr.bf16.mxu1 %v714_v6 }
 0x130   :  { %555 = vmatmul.mubr.msk.bf16.vlgmr.msra.gmra.mrb[4].mxu1 %vm85_vm0, %v801_v10 }
 0x131   :  { %559 = vmatpush3.bf16.msra.mxu1 %v803_v12  ;;  %560 = vmatprep.mubr.msk.bf16.mxu1 %vm715_vm1, %v714_v6 }
 0x132   :  { %564 = vmatprep.subr.bf16.mxu1 %v714_v6 }
 0x1fb   :  { %v186_v19 = vpop.f32.mrb[0].mxu1 }
 0x1fc   :  { %v248_v20 = vsel %vm242_vm2, -1e+38, %v186_v19  ;;  %v550_v21 = vpop.f32.mrb[1].mxu1 }
 0x1fd   :  { %v189_v22 = vpop.f32.mrb[2].mxu1  ;;  %v253_v23 = vsel %vm252_vm3, %v248_v20, -inf }
 0x1fe   :  { %v249_v24 = vsel %vm243_vm4, -1e+38, %v189_v22  ;;  %254 = vmax.xlane.f32.xlu0 %v253_v23  ;;  %v551_v25 = vpop.f32.mrb[3].mxu1 }
 0x1ff   :  { %v256_v26 = vsel %vm252_vm3, %v249_v24, -inf }
 0x202   :  { %257 = vmax.xlane.f32.xlu0 %v256_v26 }
 0x203   :  { %v230_v27 = vpop.f32.mrb[4].mxu1 }
 0x204   :  { %v250_v28 = vsel %vm242_vm2, -1e+38, %v230_v27  ;;  %v556_v29 = vpop.f32.mrb[5].mxu1 }
 0x205   :  { %v233_v30 = vpop.f32.mrb[6].mxu1  ;;  %v259_v31 = vsel %vm252_vm3, %v250_v28, -inf }
 0x206   :  { %v251_v32 = vsel %vm243_vm4, -1e+38, %v233_v30  ;;  %260 = vmax.xlane.f32.xlu1 %v259_v31  ;;  %v557_v33 = vpop.f32.mrb[7].mxu1 }
 0x207   :  { %v262_v34 = vsel %vm252_vm3, %v251_v32, -inf }
 0x20a   :  { %263 = vmax.xlane.f32.xlu1 %v262_v34 }
 0x28b   :  { %v255_v35 = vpop.xlane.xlu0 %254 }
 0x28c   :  { %v265_v36 = vsub.f32 %v248_v20, %v255_v35 }
 0x28e   :  { %v269_v37 = vmul.f32 1.442695, %v265_v36 }
 0x28f   :  { %v258_v38 = vpop.xlane.xlu0 %257 }
 0x290   :  { %599 = vpow2.f32 %v269_v37  ;;  %v266_v39 = vsub.f32 %v249_v24, %v258_v38 }
 0x292   :  { %v271_v40 = vmul.f32 1.442695, %v266_v39 }
 0x293   :  { %v261_v41 = vpop.xlane.xlu1 %260 }
 0x294   :  { %601 = vpow2.f32 %v271_v40  ;;  %v267_v42 = vsub.f32 %v250_v28, %v261_v41 }
 0x296   :  { %v273_v43 = vmul.f32 1.442695, %v267_v42 }
 0x297   :  { %v264_v44 = vpop.xlane.xlu1 %263 }
 0x298   :  { %603 = vpow2.f32 %v273_v43  ;;  %v268_v45 = vsub.f32 %v251_v32, %v264_v44 }
 0x29a   :  { %v600_v46 = vpop.eup %599  ;;  %v275_v47 = vmul.f32 1.442695, %v268_v45 }
 0x29b   :  { %v277_v48 = vsel %vm252_vm3, %v600_v46, 0.0 }
 0x29c   :  { %605 = vpow2.f32 %v275_v47  ;;  %278 = vadd.xlane.f32.xlu0 %v277_v48 }
 0x29e   :  { %v602_v49 = vpop.eup %601 }
 0x29f   :  { %v280_v50 = vsel %vm252_vm3, %v602_v49, 0.0  ;;  %v303_v51 = vpack.c.bf16 %v602_v49, %v600_v46 }
 0x2a0   :  { %281 = vadd.xlane.f32.xlu0 %v280_v50 }
 0x2a1   :  { %561 = vmatmul.mubr.msk.bf16.vlgmr.msra.gmra.mrb[8].mxu1 %vm252_vm3, %v303_v51 }
 0x2a2   :  { %v604_v52 = vpop.eup %603  ;;  %565 = vmatpush3.bf16.msra.mxu1 %v801_v10  ;;  %566 = vmatprep.mubr.msk.bf16.mxu1 %vm715_vm1, %v714_v6 }
 0x2a3   :  { %v283_v53 = vsel %vm252_vm3, %v604_v52, 0.0 }
 0x2a4   :  { %284 = vadd.xlane.f32.xlu1 %v283_v53 }
 0x2a6   :  { %v606_v54 = vpop.eup %605 }
 0x2a7   :  { %v286_v55 = vsel %vm252_vm3, %v606_v54, 0.0  ;;  %v304_v56 = vpack.c.bf16 %v606_v54, %v604_v52 }
 0x2a8   :  { %287 = vadd.xlane.f32.xlu1 %v286_v55 }
 0x2a9   :  { %567 = vmatmul.mubr.msk.bf16.vlgmr.msra.gmra.mrb[12].mxu1 %vm252_vm3, %v304_v56 }
 0x2b6   :  { %401 = vrot.lane.b32.xlu0 %v803_v12, %s716_s2 }
 0x2b9   :  { %403 = vrot.lane.b32.xlu1 %v801_v10, %s716_s2 }
 0x329   :  { %v279_v61 = vpop.xlane.xlu0 %278 }
 0x32a   :  { %607 = vrcp.f32 %v279_v61 }
 0x32d   :  { %v282_v62 = vpop.xlane.xlu0 %281 }
 0x32e   :  { %609 = vrcp.f32 %v282_v62 }
 0x331   :  { %v285_v63 = vpop.xlane.xlu1 %284  ;;  %v402_v14 = vpop.permute.xlu0 %401 }
 0x332   :  { %611 = vrcp.f32 %v285_v63 }
 0x334   :  { %v608_v1 = vpop.eup %607 }
 0x335   :  { %v288_v0 = vpop.xlane.xlu1 %287  ;;  %v299_v4 = vmul.f32 %v608_v1, %v515_v2 }
 0x336   :  { %613 = vrcp.f32 %v288_v0 }
 0x338   :  { %v610_v7 = vpop.eup %609 }
 0x339   :  { %v404_v24 = vpop.permute.xlu1 %403 }
 0x33c   :  { %v612_v13 = vpop.eup %611 }
 0x33d   :  { %v301_v17 = vmul.f32 %v612_v13, %v515_v2 }
 0x340   :  { %v614_v6 = vpop.eup %613 }
 0x374   :  { %v342_v3 = vpop.f32.mrb[8].mxu1 }
 0x375   :  { %v562_v5 = vpop.f32.mrb[9].mxu1  ;;  %v393_v9 = vmul.f32 %v342_v3, %v299_v4 }
 0x376   :  { %v345_v8 = vpop.f32.mrb[10].mxu1 }
 0x377   :  { %v394_v10 = vmul.f32 %v610_v7, %v345_v8  ;;  %v563_v11 = vpop.f32.mrb[11].mxu1 }
 0x379   :  { %v397_v12 = vpack.c.bf16 %v394_v10, %v393_v9 }
 0x37b   :  { %v407_v15 = vsel %vm85_vm0, %v397_v12, %v402_v14 }
 0x37c   :  { %v386_v16 = vpop.f32.mrb[12].mxu1  ;;  %574 = vmatprep.mubr.msk.bf16.mxu0 %vm425_vm5, %v407_v15 }
 0x37d   :  { %v568_v18 = vpop.f32.mrb[13].mxu1  ;;  %v395_v20 = vmul.f32 %v386_v16, %v301_v17 }
 0x37e   :  { %v389_v19 = vpop.f32.mrb[14].mxu1 }
 0x37f   :  { %v396_v21 = vmul.f32 %v614_v6, %v389_v19  ;;  %v569_v22 = vpop.f32.mrb[15].mxu1 }
 0x381   :  { %v398_v23 = vpack.c.bf16 %v396_v21, %v395_v20 }
 0x383   :  { %v410_v25 = vsel %vm85_vm0, %v398_v23, %v404_v24 }
 0x384   :  { %575 = vmatmul.mubr.msk.bf16.vlgmr.msra.gmra.mrb[4].mxu0 %vm425_vm5, %v410_v25 }
 0x457   :  { %v576_v26 = vpop.f32.mrb[4].mxu0 }
 0x458   :  { %487 = vst.msk [vmem:[#allocation8 + $0x10] sm:$0xff] %vm85_vm0, %v576_v26  ;;  %v470_v27 = vpop.f32.mrb[5].mxu0 }
 0x459   :  { %485 = vst.msk [vmem:[#allocation8] sm:$0xff] %vm85_vm0, %v470_v27  ;;  %v577_v28 = vpop.f32.mrb[6].mxu0 }
 0x45a   :  { %488 = vst.msk [vmem:[#allocation8 + $0x18] sm:$0xff] %vm85_vm0, %v577_v28  ;;  %v473_v29 = vpop.f32.mrb[7].mxu0 }
 0x45b   :  { %486 = vst.msk [vmem:[#allocation8 + $0x8] sm:$0xff] %vm85_vm0, %v473_v29 }
 0x45c   :  { %692 = shalt.err (!%p689_p0)
}
 0x45d   :  { %s693_s26 = scalar_lea.hbm %s869_s3, 512 }
 0x45e   :  { %p694_p1 = scmp.ne.s32.totalorder %s869_s3, %s693_s26  ;;  %p697_p2 = scmp.lt.u32.totalorder %s693_s26, %s869_s3 }
 0x460   :  { %p699_p3 = pnand %p697_p2, %p694_p1 }
 0x462   :  { %702 = shalt.err (!%p699_p3)
}
 0x463   :  { %s718_s4 = smov 128   ;;  %s719_s5 = smov 8  }
 0x464   :  { %500 = dma.vmem_to_hbm [thread:$0]  %s495_s22, 512, %s869_s3, [#allocation4], %s718_s4, %s718_s4, %s719_s5  }
 0x465   :  { %707 = dma.done.wait [#allocation4], 512  }
 0x466   :  { %708 = vsyncadd [#allocation4], 4294966784 }
 0x467   :  { %504 = vsyncpa [#allocation3], 1 }
 0x468   :  { %505 = vsyncpa [#allocation6], 1 }
 0x469   :  { %506 = vsyncpa [#allocation4], 1 }

// kernel: tpu_custom_call.1
= control target key start
LH: loop header
LB: loop body
LE: loop exit
PB: predicated region body
PF: predicated region fallthrough
CT: control target
= control target key end

     0   :  { %8 = vsyncpa [#allocation3], 0  ;;  %s866_s0 = inlined_call_operand.hbm [shape: bf16[2,16,32], index: 0, kind: input, shape index: {}]   ;;  %s867_s1 = inlined_call_operand.hbm [shape: bf16[32,32], index: 1, kind: input, shape index: {}]   ;;  %s868_s2 = inlined_call_operand.hbm [shape: bf16[32,64], index: 2, kind: input, shape index: {}]   ;;  %s869_s3 = inlined_call_operand.hbm [shape: f32[2,16,32], index: 3, kind: output, shape index: {}]  }
   0x1   :  { %9 = vsyncpa [#allocation6], 0 }
   0x2   :  { %10 = vsyncpa [#allocation4], 0  ;;  %s709_s12 = smov [#allocation5]   ;;  %s710_s14 = smov [#allocation2]  }
   0x3   :  { %s28_s13 = sshll.u32 %s709_s12, 4  ;;  %s16_s15 = sshll.u32 %s710_s14, 4  ;;  %s29_s13 = int_to_ptr.vmem [resolvable:$true] %s28_s13  ;;  %s740_s15 = int_to_ptr.vmem [resolvable:$true] %s16_s15 }
   0x4   :  { %s615_s18 = scalar_lea.hbm %s867_s1, 256 }
   0x5   :  { %p616_p0 = scmp.ne.s32.totalorder %s867_s1, %s615_s18  ;;  %p619_p1 = scmp.lt.u32.totalorder %s615_s18, %s867_s1 }
   0x7   :  { %p621_p2 = pnand %p619_p1, %p616_p0 }
   0x9   :  { %624 = shalt.err (!%p621_p2)
}
   0xa   :  { %s625_s23 = scalar_lea.vmem %s29_s13, 256  ;;  %p630_p4 = scmp.lt.s32.totalorder %s29_s13, %s29_s13 }
   0xb   :  { %p626_p3 = scmp.ne.s32.totalorder %s29_s13, %s625_s23  ;;  %p631_p5 = scmp.lt.s32.totalorder %s625_s23, %s625_s23 }
   0xd   :  { %p632_p6 = por %p631_p5, %p630_p4 }
   0xf   :  { %p633_p7 = pnand %p632_p6, %p626_p3 }
  0x11   :  { %636 = shalt.err (!%p633_p7)
}
  0x12   :  { %s711_s24 = smov 64   ;;  %s712_s25 = smov 4  }
  0x13   :  { %34 = dma.hbm_to_vmem [thread:$0]  %s867_s1, 256, %s29_s13, [#allocation6], %s711_s24, %s711_s24, %s712_s25  }
  0x14   :  { %s637_s30 = scalar_lea.hbm %s866_s0, 256 }
  0x15   :  { %p638_p8 = scmp.ne.s32.totalorder %s866_s0, %s637_s30  ;;  %p641_p9 = scmp.lt.u32.totalorder %s637_s30, %s866_s0 }
  0x17   :  { %p643_p10 = pnand %p641_p9, %p638_p8 }
  0x19   :  { %646 = shalt.err (!%p643_p10)
}
  0x1a   :  { %s647_s8 = scalar_lea.vmem %s740_s15, 256  ;;  %p652_p12 = scmp.lt.s32.totalorder %s740_s15, %s740_s15 }
  0x1b   :  { %p648_p11 = scmp.ne.s32.totalorder %s740_s15, %s647_s8  ;;  %p653_p13 = scmp.lt.s32.totalorder %s647_s8, %s647_s8 }
  0x1d   :  { %p654_p0 = por %p653_p13, %p652_p12 }
  0x1f   :  { %p655_p1 = pnand %p654_p0, %p648_p11 }
  0x21   :  { %658 = shalt.err (!%p655_p1)
}
  0x22   :  { %22 = dma.hbm_to_vmem [thread:$0]  %s866_s0, 256, %s740_s15, [#allocation3], %s711_s24, %s711_s24, %s712_s25  }
  0x23   :  { %s713_s10 = smov [#allocation7]   ;;  %s659_s14 = scalar_lea.hbm %s868_s2, 256 }
  0x24   :  { %s40_s11 = sshll.u32 %s713_s10, 4  ;;  %p660_p2 = scmp.ne.s32.totalorder %s868_s2, %s659_s14  ;;  %s41_s11 = int_to_ptr.vmem [resolvable:$true] %s40_s11 }
  0x25   :  { %p663_p3 = scmp.lt.u32.totalorder %s659_s14, %s868_s2 }
  0x27   :  { %p665_p4 = pnand %p663_p3, %p660_p2 }
  0x29   :  { %668 = shalt.err (!%p665_p4)
}
  0x2a   :  { %s669_s20 = scalar_lea.vmem %s41_s11, 256  ;;  %p674_p6 = scmp.lt.s32.totalorder %s41_s11, %s41_s11 }
  0x2b   :  { %p670_p5 = scmp.ne.s32.totalorder %s41_s11, %s669_s20  ;;  %p675_p7 = scmp.lt.s32.totalorder %s669_s20, %s669_s20 }
  0x2d   :  { %p676_p8 = por %p675_p7, %p674_p6 }
  0x2f   :  { %p677_p9 = pnand %p676_p8, %p670_p5 }
  0x31   :  { %680 = shalt.err (!%p677_p9)
}
  0x32   :  { %46 = dma.hbm_to_vmem [thread:$0]  %s868_s2, 256, %s41_s11, [#allocation6], %s711_s24, %s711_s24, %s712_s25  }
  0x33   :  { %703 = dma.done.wait [#allocation3], 256  }
  0x34   :  { %704 = vsyncadd [#allocation3], 4294967040 }
  0x35   :  { %705 = dma.done.wait [#allocation6], 512  }
  0x36   :  { %706 = vsyncadd [#allocation6], 4294966784  ;;  %vm85_vm0 = vcmask 261120   ;;  %v593_v0 = vld [vmem:[#allocation5] sm:$0xff]   ;;  %v594_v1 = vld [vmem:[#allocation5 + $0x8] sm:$0xff]   ;;  %v714_v6 = vmov 0.0   ;;  %v237_v15 = vlaneseq }
  0x37   :  { %578 = vmatprep.subr.msk.bf16.mxu0 %vm85_vm0, %v593_v0  ;;  %v93_v2 = vsel %vm85_vm0, %v593_v0, 0  ;;  %v595_v3 = vld [vmem:[#allocation2] sm:$0xff]   ;;  %v96_v4 = vsel %vm85_vm0, %v594_v1, 0  ;;  %v596_v5 = vld [vmem:[#allocation2 + $0x8] sm:$0xff]   ;;  %546 = vmatprep.subr.bf16.mxu1 %v714_v6  ;;  %vm715_vm1 = vmmov 0   ;;  %vm252_vm3 = vcmask 130048  }
  0x38   :  { %539 = vmatpush3.bf16.xpose.msra.mxu0 %v93_v2  ;;  %542 = vmatprep.mubr.msk.bf16.mxu0 %vm85_vm0, %v595_v3  ;;  %v821_v16 = vshrl.u32 %v237_v15, 7  ;;  %v241_v17 = vand.u32 127, %v237_v15  ;;  %s716_s2 = smov 32   ;;  %v597_v57 = vld [vmem:[#allocation7] sm:$0xff]   ;;  %vm425_vm5 = vcmask 523264   ;;  %v598_v59 = vld [vmem:[#allocation7 + $0x8] sm:$0xff]  }
  0x39   :  { %579 = vmatprep.subr.msk.bf16.mxu0 %vm85_vm0, %v594_v1  ;;  %548 = vmatprep.mubr.msk.bf16.mxu1 %vm715_vm1, %v714_v6  ;;  %v431_v58 = vsel %vm425_vm5, %v597_v57, 0  ;;  %v434_v60 = vsel %vm425_vm5, %v598_v59, 0  ;;  %s717_s21 = smov [#allocation8]  }
  0x3a   :  { %v239_v18 = vadd.s32 8, %v821_v16  ;;  %vm242_vm2 = vcmp.ge.s32.totalorder %v241_v17, %v821_v16  ;;  %vm293_vm6 = vcmp.ne.s32.totalorder %v821_v16, 0  ;;  %s494_s22 = sshll.u32 %s717_s21, 4  ;;  %s495_s22 = int_to_ptr.vmem [resolvable:$true] %s494_s22 }
  0x3b   :  { %v515_v2 = vsel %vm293_vm6, 1.0, %v714_v6  ;;  %s681_s23 = scalar_lea.vmem %s495_s22, 512  ;;  %p686_p11 = scmp.lt.s32.totalorder %s495_s22, %s495_s22 }
  0x3c   :  { %vm243_vm4 = vcmp.ge.s32.totalorder %v241_v17, %v239_v18  ;;  %p682_p10 = scmp.ne.s32.totalorder %s495_s22, %s681_s23  ;;  %p687_p12 = scmp.lt.s32.totalorder %s681_s23, %s681_s23 }
  0x3e   :  { %p688_p13 = por %p687_p12, %p686_p11 }
  0x40   :  { %541 = vmatpush3.bf16.xpose.msra.mxu0 %v96_v4  ;;  %p689_p0 = pnand %p688_p13, %p682_p10 }
  0x41   :  { %580 = vmatprep.subr.msk.bf16.mxu0 %vm425_vm5, %v597_v57 }
  0x47   :  { %543 = vmatmul.mubr.msk.bf16.vlgmr.msra.gmra.mrb[0].mxu0 %vm85_vm0, %v596_v5 }
  0x48   :  { %571 = vmatpush3.bf16.xpose.msra.mxu0 %v431_v58 }
  0x49   :  { %581 = vmatprep.subr.msk.bf16.mxu0 %vm425_vm5, %v598_v59 }
  0x50   :  { %573 = vmatpush3.bf16.xpose.msra.mxu0 %v434_v60 }
 0x11a   :  { %v544_v7 = vpop.f32.mrb[0].mxu0 }
 0x11b   :  { %v132_v8 = vpop.f32.mrb[1].mxu0 }
 0x11c   :  { %v545_v9 = vpop.f32.mrb[2].mxu0 }
 0x11d   :  { %v801_v10 = vpack.c.bf16 %v545_v9, %v544_v7  ;;  %v135_v11 = vpop.f32.mrb[3].mxu0 }
 0x11e   :  { %v803_v12 = vpack.c.bf16 %v135_v11, %v132_v8 }
 0x11f   :  { %v194_v14 = vsel %vm85_vm0, %v801_v10, 0 }
 0x120   :  { %v150_v13 = vsel %vm85_vm0, %v803_v12, 0 }
 0x121   :  { %547 = vmatpush3.bf16.xpose.msra.mxu1 %v150_v13 }
 0x122   :  { %552 = vmatprep.subr.bf16.mxu1 %v714_v6 }
 0x128   :  { %549 = vmatmul.mubr.msk.bf16.vlgmr.msra.gmra.mrb[0].mxu1 %vm85_vm0, %v803_v12 }
 0x129   :  { %553 = vmatpush3.bf16.xpose.msra.mxu1 %v194_v14  ;;  %554 = vmatprep.mubr.msk.bf16.mxu1 %vm715_vm1, %v714_v6 }
 0x12a   :  { %558 = vmatprep.subr.bf16.mxu1 %v714_v6 }
 0x130   :  { %555 = vmatmul.mubr.msk.bf16.vlgmr.msra.gmra.mrb[4].mxu1 %vm85_vm0, %v801_v10 }
 0x131   :  { %559 = vmatpush3.bf16.msra.mxu1 %v803_v12  ;;  %560 = vmatprep.mubr.msk.bf16.mxu1 %vm715_vm1, %v714_v6 }
 0x132   :  { %564 = vmatprep.subr.bf16.mxu1 %v714_v6 }
 0x1fb   :  { %v186_v19 = vpop.f32.mrb[0].mxu1 }
 0x1fc   :  { %v248_v20 = vsel %vm242_vm2, -1e+38, %v186_v19  ;;  %v550_v21 = vpop.f32.mrb[1].mxu1 }
 0x1fd   :  { %v189_v22 = vpop.f32.mrb[2].mxu1  ;;  %v253_v23 = vsel %vm252_vm3, %v248_v20, -inf }
 0x1fe   :  { %v249_v24 = vsel %vm243_vm4, -1e+38, %v189_v22  ;;  %254 = vmax.xlane.f32.xlu0 %v253_v23  ;;  %v551_v25 = vpop.f32.mrb[3].mxu1 }
 0x1ff   :  { %v256_v26 = vsel %vm252_vm3, %v249_v24, -inf }
 0x202   :  { %257 = vmax.xlane.f32.xlu0 %v256_v26 }
 0x203   :  { %v230_v27 = vpop.f32.mrb[4].mxu1 }
 0x204   :  { %v250_v28 = vsel %vm242_vm2, -1e+38, %v230_v27  ;;  %v556_v29 = vpop.f32.mrb[5].mxu1 }
 0x205   :  { %v233_v30 = vpop.f32.mrb[6].mxu1  ;;  %v259_v31 = vsel %vm252_vm3, %v250_v28, -inf }
 0x206   :  { %v251_v32 = vsel %vm243_vm4, -1e+38, %v233_v30  ;;  %260 = vmax.xlane.f32.xlu1 %v259_v31  ;;  %v557_v33 = vpop.f32.mrb[7].mxu1 }
 0x207   :  { %v262_v34 = vsel %vm252_vm3, %v251_v32, -inf }
 0x20a   :  { %263 = vmax.xlane.f32.xlu1 %v262_v34 }
 0x28b   :  { %v255_v35 = vpop.xlane.xlu0 %254 }
 0x28c   :  { %v265_v36 = vsub.f32 %v248_v20, %v255_v35 }
 0x28e   :  { %v269_v37 = vmul.f32 1.442695, %v265_v36 }
 0x28f   :  { %v258_v38 = vpop.xlane.xlu0 %257 }
 0x290   :  { %599 = vpow2.f32 %v269_v37  ;;  %v266_v39 = vsub.f32 %v249_v24, %v258_v38 }
 0x292   :  { %v271_v40 = vmul.f32 1.442695, %v266_v39 }
 0x293   :  { %v261_v41 = vpop.xlane.xlu1 %260 }
 0x294   :  { %601 = vpow2.f32 %v271_v40  ;;  %v267_v42 = vsub.f32 %v250_v28, %v261_v41 }
 0x296   :  { %v273_v43 = vmul.f32 1.442695, %v267_v42 }
 0x297   :  { %v264_v44 = vpop.xlane.xlu1 %263 }
 0x298   :  { %603 = vpow2.f32 %v273_v43  ;;  %v268_v45 = vsub.f32 %v251_v32, %v264_v44 }
 0x29a   :  { %v600_v46 = vpop.eup %599  ;;  %v275_v47 = vmul.f32 1.442695, %v268_v45 }
 0x29b   :  { %v277_v48 = vsel %vm252_vm3, %v600_v46, 0.0 }
 0x29c   :  { %605 = vpow2.f32 %v275_v47  ;;  %278 = vadd.xlane.f32.xlu0 %v277_v48 }
 0x29e   :  { %v602_v49 = vpop.eup %601 }
 0x29f   :  { %v280_v50 = vsel %vm252_vm3, %v602_v49, 0.0  ;;  %v303_v51 = vpack.c.bf16 %v602_v49, %v600_v46 }
 0x2a0   :  { %281 = vadd.xlane.f32.xlu0 %v280_v50 }
 0x2a1   :  { %561 = vmatmul.mubr.msk.bf16.vlgmr.msra.gmra.mrb[8].mxu1 %vm252_vm3, %v303_v51 }
 0x2a2   :  { %v604_v52 = vpop.eup %603  ;;  %565 = vmatpush3.bf16.msra.mxu1 %v801_v10  ;;  %566 = vmatprep.mubr.msk.bf16.mxu1 %vm715_vm1, %v714_v6 }
 0x2a3   :  { %v283_v53 = vsel %vm252_vm3, %v604_v52, 0.0 }
 0x2a4   :  { %284 = vadd.xlane.f32.xlu1 %v283_v53 }
 0x2a6   :  { %v606_v54 = vpop.eup %605 }
 0x2a7   :  { %v286_v55 = vsel %vm252_vm3, %v606_v54, 0.0  ;;  %v304_v56 = vpack.c.bf16 %v606_v54, %v604_v52 }
 0x2a8   :  { %287 = vadd.xlane.f32.xlu1 %v286_v55 }
 0x2a9   :  { %567 = vmatmul.mubr.msk.bf16.vlgmr.msra.gmra.mrb[12].mxu1 %vm252_vm3, %v304_v56 }
 0x2b6   :  { %401 = vrot.lane.b32.xlu0 %v803_v12, %s716_s2 }
 0x2b9   :  { %403 = vrot.lane.b32.xlu1 %v801_v10, %s716_s2 }
 0x329   :  { %v279_v61 = vpop.xlane.xlu0 %278 }
 0x32a   :  { %607 = vrcp.f32 %v279_v61 }
 0x32d   :  { %v282_v62 = vpop.xlane.xlu0 %281 }
 0x32e   :  { %609 = vrcp.f32 %v282_v62 }
 0x331   :  { %v285_v63 = vpop.xlane.xlu1 %284  ;;  %v402_v14 = vpop.permute.xlu0 %401 }
 0x332   :  { %611 = vrcp.f32 %v285_v63 }
 0x334   :  { %v608_v1 = vpop.eup %607 }
 0x335   :  { %v288_v0 = vpop.xlane.xlu1 %287  ;;  %v299_v4 = vmul.f32 %v608_v1, %v515_v2 }
 0x336   :  { %613 = vrcp.f32 %v288_v0 }
 0x338   :  { %v610_v7 = vpop.eup %609 }
 0x339   :  { %v404_v24 = vpop.permute.xlu1 %403 }
 0x33c   :  { %v612_v13 = vpop.eup %611 }
 0x33d   :  { %v301_v17 = vmul.f32 %v612_v13, %v515_v2 }
 0x340   :  { %v614_v6 = vpop.eup %613 }
 0x374   :  { %v342_v3 = vpop.f32.mrb[8].mxu1 }
 0x375   :  { %v562_v5 = vpop.f32.mrb[9].mxu1  ;;  %v393_v9 = vmul.f32 %v342_v3, %v299_v4 }
 0x376   :  { %v345_v8 = vpop.f32.mrb[10].mxu1 }
 0x377   :  { %v394_v10 = vmul.f32 %v610_v7, %v345_v8  ;;  %v563_v11 = vpop.f32.mrb[11].mxu1 }
 0x379   :  { %v397_v12 = vpack.c.bf16 %v394_v10, %v393_v9 }
 0x37b   :  { %v407_v15 = vsel %vm85_vm0, %v397_v12, %v402_v14 }
 0x37c   :  { %v386_v16 = vpop.f32.mrb[12].mxu1  ;;  %574 = vmatprep.mubr.msk.bf16.mxu0 %vm425_vm5, %v407_v15 }
 0x37d   :  { %v568_v18 = vpop.f32.mrb[13].mxu1  ;;  %v395_v20 = vmul.f32 %v386_v16, %v301_v17 }
 0x37e   :  { %v389_v19 = vpop.f32.mrb[14].mxu1 }
 0x37f   :  { %v396_v21 = vmul.f32 %v614_v6, %v389_v19  ;;  %v569_v22 = vpop.f32.mrb[15].mxu1 }
 0x381   :  { %v398_v23 = vpack.c.bf16 %v396_v21, %v395_v20 }
 0x383   :  { %v410_v25 = vsel %vm85_vm0, %v398_v23, %v404_v24 }
 0x384   :  { %575 = vmatmul.mubr.msk.bf16.vlgmr.msra.gmra.mrb[4].mxu0 %vm425_vm5, %v410_v25 }
 0x457   :  { %v576_v26 = vpop.f32.mrb[4].mxu0 }
 0x458   :  { %487 = vst.msk [vmem:[#allocation8 + $0x10] sm:$0xff] %vm85_vm0, %v576_v26  ;;  %v470_v27 = vpop.f32.mrb[5].mxu0 }
 0x459   :  { %485 = vst.msk [vmem:[#allocation8] sm:$0xff] %vm85_vm0, %v470_v27  ;;  %v577_v28 = vpop.f32.mrb[6].mxu0 }
 0x45a   :  { %488 = vst.msk [vmem:[#allocation8 + $0x18] sm:$0xff] %vm85_vm0, %v577_v28  ;;  %v473_v29 = vpop.f32.mrb[7].mxu0 }
 0x45b   :  { %486 = vst.msk [vmem:[#allocation8 + $0x8] sm:$0xff] %vm85_vm0, %v473_v29 }
 0x45c   :  { %692 = shalt.err (!%p689_p0)
}
 0x45d   :  { %s693_s26 = scalar_lea.hbm %s869_s3, 512 }
 0x45e   :  { %p694_p1 = scmp.ne.s32.totalorder %s869_s3, %s693_s26  ;;  %p697_p2 = scmp.lt.u32.totalorder %s693_s26, %s869_s3 }
 0x460   :  { %p699_p3 = pnand %p697_p2, %p694_p1 }
 0x462   :  { %702 = shalt.err (!%p699_p3)
}
 0x463   :  { %s718_s4 = smov 128   ;;  %s719_s5 = smov 8  }
 0x464   :  { %500 = dma.vmem_to_hbm [thread:$0]  %s495_s22, 512, %s869_s3, [#allocation4], %s718_s4, %s718_s4, %s719_s5  }
 0x465   :  { %707 = dma.done.wait [#allocation4], 512  }
 0x466   :  { %708 = vsyncadd [#allocation4], 4294966784 }
 0x467   :  { %504 = vsyncpa [#allocation3], 1 }
 0x468   :  { %505 = vsyncpa [#allocation6], 1 }
 0x469   :  { %506 = vsyncpa [#allocation4], 1 }

</bundles_post_ra>
